<compile_context>
chip_gen: v6e
topology: v6e:2x2x1
jax: 0.10.0
libtpu: 0.0.40
codegen_flags: <defaults>
</compile_context>

<pallas_src>
import numpy as np
import jax
import jax.numpy as jnp
from jax.experimental import pallas as pl
from jax.experimental.pallas import tpu as pltpu

N_PAD = 128     # lane-dense padded head dimension
TILE_B = 128    # batch tile (multiple of 16 for bf16 sublane packing)


def actor_layer_kernel(x_ref, w_ref, c_ref, o_ref):
    # x_ref: (TILE_B, F)   bf16 input tile
    # w_ref: (F, N_PAD)    bf16 concatenated+padded head weights (VMEM-resident)
    # c_ref: (8, N_PAD)    f32 packed epilogue constants:
    #                      row 0 = bias, row 1 = pass_gain (1 for discrete cols),
    #                      row 2 = scale (cont cols), row 3 = offset (mean - 0.5*scale)
    # o_ref: (TILE_B, N_PAD) f32 output tile
    y = jnp.dot(x_ref[...], w_ref[...], preferred_element_type=jnp.float32)
    bias      = c_ref[0:1, :]
    pass_gain = c_ref[1:2, :]
    scale     = c_ref[2:3, :]
    offset    = c_ref[3:4, :]
    y = y + bias
    # discrete cols: pass_gain=1, scale=0, offset=0      -> y (raw logits)
    # continuous cols: pass_gain=0                       -> sigmoid(y)*scale + offset
    #                                                     = (sigmoid(y)-0.5)*scale + mean
    o_ref[...] = (y * pass_gain + jax.nn.sigmoid(y) * scale + offset).astype(o_ref.dtype)


def actor_layer_forward(x, w_pad, consts, *, tile_b=TILE_B):
    """x: (B, F) f32.  w_pad: (F, N_PAD) f32.  consts: (8, N_PAD) f32.
    Returns (B, N_PAD) f32 fused head output (padded columns are zero)."""
    B, F = x.shape
    n_pad = w_pad.shape[1]

    # Pad batch to a multiple of the tile (sliced off at the end).
    b_pad = pl.cdiv(B, tile_b) * tile_b
    if b_pad != B:
        x = jnp.pad(x, ((0, b_pad - B), (0, 0)))

    # bf16 MXU inputs, f32 accumulation inside the kernel.
    x_bf = x.astype(jnp.bfloat16)
    w_bf = w_pad.astype(jnp.bfloat16)

    grid = (b_pad // tile_b,)
    cost = pl.CostEstimate(
        flops=2 * b_pad * F * n_pad,
        transcendentals=b_pad * n_pad,
        bytes_accessed=(x_bf.size * 2 + w_bf.size * 2
                        + consts.size * 4 + b_pad * n_pad * 4),
    )

    out = pl.pallas_call(
        actor_layer_kernel,
        out_shape=jax.ShapeDtypeStruct((b_pad, n_pad), jnp.float32),
        grid=grid,
        in_specs=[
            pl.BlockSpec((tile_b, F), lambda i: (i, 0)),      # x: tiled over batch
            pl.BlockSpec((F, n_pad), lambda i: (0, 0)),       # W: resident across steps
            pl.BlockSpec((8, n_pad), lambda i: (0, 0)),       # constants: resident
        ],
        out_specs=pl.BlockSpec((tile_b, n_pad), lambda i: (i, 0)),
        compiler_params=pltpu.CompilerParams(
            dimension_semantics=("parallel",)),               # 2-TC shard on v7x
        cost_estimate=cost,
    )(x_bf, w_bf, consts)
    return out[:B]


def build_actor_layer_params(features, nvec, box_low, box_high, key):
    """Build concatenated + lane-padded parameters for:
       - discrete heads: one nn.Linear(features, n) per n in nvec
       - continuous head: nn.Linear(features, len(box_low)) + Sigmoid + affine
    Returns (W_pad (F, N_PAD) f32, consts (8, N_PAD) f32, head_sizes)."""
    head_sizes = list(nvec) + [len(box_low)]
    n_total = sum(head_sizes)
    assert n_total <= N_PAD

    bound = 1.0 / np.sqrt(features)  # PyTorch default Linear init range
    ws, bs = [], []
    for sz in head_sizes:
        key, k_w, k_b = jax.random.split(key, 3)
        ws.append(jax.random.uniform(k_w, (features, sz), jnp.float32, -bound, bound))
        bs.append(jax.random.uniform(k_b, (1, sz), jnp.float32, -bound, bound))
    W = np.concatenate([np.asarray(w) for w in ws], axis=1)       # (F, N)
    b = np.concatenate([np.asarray(v) for v in bs], axis=1)[0]    # (N,)

    # Zero-pad head dimension to N_PAD (lane-dense output).
    W_pad = np.zeros((features, N_PAD), np.float32)
    W_pad[:, :n_total] = W

    off = sum(nvec)
    lo = np.asarray(box_low, np.float32)
    hi = np.asarray(box_high, np.float32)
    scale = (hi - lo) * 0.5
    mean = (hi + lo) * 0.5

    consts = np.zeros((8, N_PAD), np.float32)
    consts[0, :n_total] = b                                  # bias
    consts[1, :off] = 1.0                                    # pass_gain (discrete cols)
    consts[2, off:n_total] = scale                           # scale (continuous cols)
    consts[3, off:n_total] = mean - 0.5 * scale              # offset = mean - 0.5*scale
    return jnp.asarray(W_pad), jnp.asarray(consts), head_sizes


def split_heads(out, head_sizes):
    """Recover the flattened list-of-tensors structure of ActorLayer.forward
    (slices away the lane padding)."""
    outs, off = [], 0
    for sz in head_sizes:
        outs.append(out[:, off:off + sz])
        off += sz
    return outs


if __name__ == "__main__":
    key = jax.random.PRNGKey(0)

    batch = 512                        # batched over envs/timesteps; grid = 4 tiles of 128
    features = 32
    nvec = [5, 3]                      # MultiDiscrete head sizes
    box_low = [-2.0, -2.0, -1.0, 0.0]  # Box action space
    box_high = [2.0, 2.0, 1.0, 4.0]

    key, k_x = jax.random.split(key)
    x = jax.random.normal(k_x, (batch, features), jnp.float32)

    W_pad, consts, head_sizes = build_actor_layer_params(
        features, nvec, box_low, box_high, key)

    out = actor_layer_forward(x, W_pad, consts)
    out = jax.block_until_ready(out)

    # Reference check (pure JAX) with identical bf16 inputs / f32 accumulation.
    x_bf = x.astype(jnp.bfloat16)
    w_bf = W_pad.astype(jnp.bfloat16)
    y_ref = jnp.dot(x_bf, w_bf, preferred_element_type=jnp.float32) + consts[0:1, :]
    ref = y_ref * consts[1:2, :] + jax.nn.sigmoid(y_ref) * consts[2:3, :] + consts[3:4, :]

    n_valid = sum(head_sizes)
    np.testing.assert_allclose(np.asarray(out[:, :n_valid]),
                               np.asarray(ref[:, :n_valid]),
                               rtol=1e-3, atol=1e-3)

    outs = split_heads(out, head_sizes)  # [logits(B,5), logits(B,3), cont(B,4)]
    assert [o.shape for o in outs] == [(batch, 5), (batch, 3), (batch, 4)]

    print("KERNEL_OK")
</pallas_src>

<mosaic_0001>
module attributes {stable_mosaic.version = 11 : i64} {
  func.func @actor_layer_kernel(%arg0: i32, %arg1: memref<128x32xbf16, #tpu.memory_space<vmem>>, %arg2: memref<32x128xbf16, #tpu.memory_space<vmem>>, %arg3: memref<8x128xf32, #tpu.memory_space<vmem>>, %arg4: memref<128x128xf32, #tpu.memory_space<vmem>>) attributes {dimension_semantics = [#tpu.dimension_semantics<parallel>], iteration_bounds = array<i64: 4>, scalar_prefetch = 0 : i64, scratch_operands = 0 : i64, tpu.core_type = #tpu.core_type<tc>, window_params = [{transform_indices = @transform_0, window_bounds = array<i64: 128, 32>}, {pipeline_mode = #tpu.pipeline_mode<synchronous>, transform_indices = @transform_1, window_bounds = array<i64: 32, 128>}, {pipeline_mode = #tpu.pipeline_mode<synchronous>, transform_indices = @transform_2, window_bounds = array<i64: 8, 128>}, {transform_indices = @transform_3, window_bounds = array<i64: 128, 128>}]} {
    %c0 = arith.constant 0 : index
    %c0_0 = arith.constant 0 : index
    %0 = vector.load %arg1[%c0, %c0_0] : memref<128x32xbf16, #tpu.memory_space<vmem>>, vector<128x32xbf16>
    %c0_1 = arith.constant 0 : index
    %c0_2 = arith.constant 0 : index
    %1 = vector.load %arg2[%c0_1, %c0_2] : memref<32x128xbf16, #tpu.memory_space<vmem>>, vector<32x128xbf16>
    %cst = arith.constant dense<0.000000e+00> : vector<128x128xf32>
    %2 = tpu.matmul %0, %1, %cst {dimension_numbers = #tpu.dot_dimension_numbers<[1], [0], [0], [1], [0, 0, 1, 1], [], []>} : vector<128x32xbf16>, vector<32x128xbf16>, vector<128x128xf32> -> vector<128x128xf32>
    %c0_3 = arith.constant 0 : index
    %c0_4 = arith.constant 0 : index
    %3 = vector.load %arg3[%c0_3, %c0_4] : memref<8x128xf32, #tpu.memory_space<vmem>>, vector<1x128xf32>
    %c1 = arith.constant 1 : index
    %c0_5 = arith.constant 0 : index
    %4 = vector.load %arg3[%c1, %c0_5] : memref<8x128xf32, #tpu.memory_space<vmem>>, vector<1x128xf32>
    %c2 = arith.constant 2 : index
    %c0_6 = arith.constant 0 : index
    %5 = vector.load %arg3[%c2, %c0_6] : memref<8x128xf32, #tpu.memory_space<vmem>>, vector<1x128xf32>
    %c3 = arith.constant 3 : index
    %c0_7 = arith.constant 0 : index
    %6 = vector.load %arg3[%c3, %c0_7] : memref<8x128xf32, #tpu.memory_space<vmem>>, vector<1x128xf32>
    %7 = vector.broadcast %3 : vector<1x128xf32> to vector<128x128xf32>
    %8 = arith.addf %2, %7 : vector<128x128xf32>
    %9 = vector.broadcast %4 : vector<1x128xf32> to vector<128x128xf32>
    %10 = arith.mulf %8, %9 : vector<128x128xf32>
    %11 = arith.negf %8 : vector<128x128xf32>
    %12 = math.exp %11 : vector<128x128xf32>
    %cst_8 = arith.constant 1.000000e+00 : f32
    %13 = vector.broadcast %cst_8 : f32 to vector<128x128xf32>
    %14 = arith.addf %13, %12 : vector<128x128xf32>
    %15 = arith.divf %13, %14 : vector<128x128xf32>
    %16 = vector.broadcast %5 : vector<1x128xf32> to vector<128x128xf32>
    %17 = arith.mulf %15, %16 : vector<128x128xf32>
    %18 = arith.addf %10, %17 : vector<128x128xf32>
    %19 = vector.broadcast %6 : vector<1x128xf32> to vector<128x128xf32>
    %20 = arith.addf %18, %19 : vector<128x128xf32>
    %c0_9 = arith.constant 0 : index
    %c0_10 = arith.constant 0 : index
    %21 = vector.load %arg4[%c0_9, %c0_10] : memref<128x128xf32, #tpu.memory_space<vmem>>, vector<128x128xf32>
    tpu.vector_store %arg4[%c0_9, %c0_10], %20 {strides = array<i32>} : memref<128x128xf32, #tpu.memory_space<vmem>>, vector<128x128xf32>,
    return
  }
  func.func @transform_0(%arg0: i32) -> (i32, i32) {
    %c0_i32 = arith.constant 0 : i32
    %c0_i32_0 = arith.constant 0 : i32
    return %arg0, %c0_i32 : i32, i32
  }
  func.func @transform_1(%arg0: i32) -> (i32, i32) {
    %c0_i32 = arith.constant 0 : i32
    %c0_i32_0 = arith.constant 0 : i32
    %c0_i32_1 = arith.constant 0 : i32
    return %c0_i32, %c0_i32_0 : i32, i32
  }
  func.func @transform_2(%arg0: i32) -> (i32, i32) {
    %c0_i32 = arith.constant 0 : i32
    %c0_i32_0 = arith.constant 0 : i32
    %c0_i32_1 = arith.constant 0 : i32
    return %c0_i32, %c0_i32_0 : i32, i32
  }
  func.func @transform_3(%arg0: i32) -> (i32, i32) {
    %c0_i32 = arith.constant 0 : i32
    %c0_i32_0 = arith.constant 0 : i32
    return %arg0, %c0_i32 : i32, i32
  }
}

</mosaic_0001>

<bundles_post_ra>
// kernel: tpu_custom_call.1
= control target key start
LH: loop header
LB: loop body
LE: loop exit
PB: predicated region body
PF: predicated region fallthrough
CT: control target
= control target key end

     0   :  { %8 = vsyncpa [#allocation3], 0  ;;  %s1192_s0 = inlined_call_operand.vmem [shape: bf16[512,32], index: 0, kind: input, shape index: {}]   ;;  %s1193_s1 = inlined_call_operand.vmem [shape: bf16[32,128], index: 1, kind: input, shape index: {}]   ;;  %s1194_s2 = inlined_call_operand.vmem [shape: f32[8,128], index: 2, kind: input, shape index: {}]   ;;  %s1195_s3 = inlined_call_operand.hbm [shape: f32[512,128], index: 3, kind: output, shape index: {}]  }
   0x1   :  { %10 = vsyncpa [#allocation3 + $0x1], 0  ;;  %s924_s12 = smov 0   ;;  %s926_s13 = smov 0  }
   0x2   :  { %s928_s14 = smov 0   ;;  %s930_s15 = smov 0  }
   0x3 LB: > { %s945_s16 = sadd.s32 4294967295, %s899_s15   ;;  %s639_s17 = sadd.s32 4294967294, %s899_s15   ;;  %s899_s15 = sphi %s930_s15, %s1201_s15   ;;  %s895_s14 = sphi %s928_s14, %s1200_s14   ;;  %s891_s13 = sphi %s926_s13, %s1199_s13   ;;  %s887_s12 = sphi %s924_s12, %s1198_s12  }
   0x4   : > { %s949_s18 = sadd.s32 1, %s899_s15   ;;  %s91_s19 = sadd.s32 1, %s895_s14 }
   0x5   : > { %s88_s20 = ssub.s32 %s899_s15, %s949_s18  ;;  %p101_p0 = scmp.ne.s32.totalorder %s895_s14, %s891_s13 }
   0x6   : > { %p89_p1 = scmp.eq.s32.totalorder %s88_s20, 0  ;;  %p102_p2 = scmp.eq.s32.totalorder %s945_s16, 3 }
   0x7   : > { %p107_p3 = scmp.ne.s32.totalorder %s891_s13, %s887_s12  ;;  %p108_p4 = scmp.eq.s32.totalorder %s639_s17, 3 }
   0x8   : > { %s960_s21 = scalar_select %p89_p1, %s895_s14, %s91_s19  }
   0x9   : > { %p962_p5 = por %p102_p2, %p101_p0  ;;  %p966_p6 = por %p108_p4, %p107_p3 }
   0xa   : > { %p642_p7 = scmp.ge.s32.totalorder %s899_s15, 1  ;;  %p141_p8 = scmp.lt.s32.totalorder %s899_s15, 5 }
   0xc   : > { %p142_p9 = pnand %p642_p7, %p141_p8 }
   0xd   : > { %s644_s26 = sshll.u32 (!%p142_p9), %s945_s16, 4  ;;  %s162_s8 = sand.u32 (!%p142_p9), 1, %s891_s13  }
   0xe   : > { %145 = sbr.rel (%p142_p9) target bundleno = 290 (0x122), region = 32  ;;  %p166_p10 = scmp.lt.s32.totalorder (!%p142_p9), %s644_s26, 63 }
   0xf   : > { %s643_s19 = sshll.u32 (!%p142_p9), %s162_s8, 7 }
  0x10   : > { %s1079_s25 = scalar_lea.vmem (!%p142_p9), [#allocation2], %s643_s19 }
  0x11   : > { %s577_s27 = sshll.u32 (!%p142_p9), %s1079_s25, 4  ;;  %s1144_s27 = int_to_ptr.vmem [resolvable:$true] %s577_s27 }
  0x12   : > { %s839_s4 = scalar_lea.vmem (!%p142_p9), %s1144_s27, 2048 }
  0x13   : > { %v765_v0 = vld [vmem:[%s1193_s1 + $0x8] sm:$0xff]   ;;  %v766_v1 = vld [vmem:[%s1193_s1] sm:$0xff]   ;;  %s1203_s26 = smov (!%p166_p10, %s644_s26), 63  ;;  %vm253_vm0 = vcmask 261120   ;;  %p840_p11 = scmp.ne.s32.totalorder %s1144_s27, %s839_s4 }
  0x14   : > { %700 = vmatprep.subr.bf16.mxu0 %v765_v0  ;;  %720 = vmatprep.subr.bf16.mxu1 %v765_v0  ;;  %s645_s29 = sshll.u32 %s1203_s26, 2  ;;  %v646_v10 = vld [vmem:[%s1194_s2] ss:$0 sm:$0xff]  ;;  %s689_s26 = sshll.u32 %s945_s16, 11 }
  0x15   : > { %701 = vmatpush3.bf16.msra.mxu0 %v765_v0  ;;  %722 = vmatpush3.bf16.msra.mxu1 %v765_v0  ;;  %s169_s5 = scalar_lea.vmem %s1192_s0, %s645_s29  ;;  %s1142_s30 = scalar_lea.hbm %s1195_s3, %s689_s26 }
  0x16   : > { %702 = vmatprep.subr.bf16.mxu0 %v766_v1  ;;  %721 = vmatprep.subr.bf16.mxu1 %v766_v1  ;;  %v767_v2 = vld [vmem:[%s169_s5] sm:$0xff]   ;;  %v769_v4 = vld [vmem:[%s169_s5 + $0x8] sm:$0xff]   ;;  %v771_v6 = vld [vmem:[%s169_s5 + $0x10] sm:$0xff]   ;;  %s1152_s16 = scalar_lea.sflag [#allocation3], %s162_s8  ;;  %p841_p12 = pnand %p840_p11, %p962_p5 }
  0x17   : > { %v768_v3 = vld [vmem:[%s169_s5 + $0x20] sm:$0xff]   ;;  %704 = vmatprep.mubr.msk.bf16.mxu0 %vm253_vm0, %v767_v2  ;;  %v770_v5 = vld [vmem:[%s169_s5 + $0x28] sm:$0xff]   ;;  %v772_v7 = vld [vmem:[%s169_s5 + $0x30] sm:$0xff]  }
  0x18   : > { %712 = vmatprep.mubr.msk.bf16.mxu1 %vm253_vm0, %v768_v3  ;;  %v773_v8 = vld [vmem:[%s169_s5 + $0x18] sm:$0xff]   ;;  %p842_p13 = pneg %p841_p12 }
  0x19   : > { %703 = vmatpush3.bf16.msra.mxu0 %v766_v1  ;;  %723 = vmatpush3.bf16.msra.mxu1 %v766_v1  ;;  %v774_v9 = vld [vmem:[%s169_s5 + $0x38] sm:$0xff]   ;;  %s901_s5 = smov [#allocation2]  }
  0x1a   : > { %s843_s6 = sshll.u32 %s901_s5, 4  ;;  %s844_s6 = int_to_ptr.vmem [resolvable:$false] %s843_s6 }
  0x1b   : > { %s845_s7 = scalar_lea.vmem %s844_s6, 4096  ;;  %p846_p0 = scmp.lt.s32.totalorder %s1144_s27, %s844_s6 }
  0x1c   : > { %705 = vmatmul.mubr.msk.bf16.vlgmr.msra.gmra.mxu0 %vm253_vm0, %v769_v4  ;;  %713 = vmatmul.mubr.msk.bf16.vlgmr.msra.gmra.mxu1 %vm253_vm0, %v770_v5  ;;  %p847_p1 = scmp.lt.s32.totalorder %s845_s7, %s839_s4 }
  0x1d   : > { %708 = vmatprep.mubr.msk.bf16.mxu0 %vm253_vm0, %v771_v6  ;;  %716 = vmatprep.mubr.msk.bf16.mxu1 %vm253_vm0, %v772_v7 }
  0x1e   : > { %p848_p2 = por %p847_p1, %p846_p0 }
  0x20   : > { %p849_p3 = pnand %p848_p2, %p842_p13 }
  0x24   : > { %709 = vmatmul.mubr.msk.bf16.gmra.mxu0 %vm253_vm0, %v773_v8  ;;  %717 = vmatmul.mubr.msk.bf16.gmra.mxu1 %vm253_vm0, %v774_v9 }
  0xdc   : > { %v706_v11 = vpop.f32.mrf.mxu0  ;;  %v714_v13 = vpop.f32.mrf.mxu1 }
  0xdd   : > { %v993_v12 = vadd.f32 %v706_v11, %v646_v10  ;;  %v995_v14 = vadd.f32 %v714_v13, %v646_v10 }
  0xde   : > { %v312_v15 = vpop.f32.mrf.mxu0  ;;  %v344_v18 = vpop.f32.mrf.mxu1 }
  0xdf   : > { %v668_v16 = vmul.f32 -1.442695, %v993_v12  ;;  %v998_v17 = vadd.f32 %v646_v10, %v312_v15  ;;  %v676_v19 = vmul.f32 -1.442695, %v995_v14  ;;  %v1001_v20 = vadd.f32 %v646_v10, %v344_v18 }
  0xe0   : > { %v707_v21 = vpop.f32.mrf.mxu0  ;;  %v715_v24 = vpop.f32.mrf.mxu1 }
  0xe1   : > { %775 = vpow2.f32 %v668_v16  ;;  %v666_v22 = vmul.f32 -1.442695, %v998_v17  ;;  %v1004_v23 = vadd.f32 %v707_v21, %v646_v10  ;;  %v674_v25 = vmul.f32 -1.442695, %v1001_v20 }
  0xe2   : > { %777 = vpow2.f32 %v676_v19  ;;  %v1007_v26 = vadd.f32 %v715_v24, %v646_v10  ;;  %v315_v27 = vpop.f32.mrf.mxu0  ;;  %v347_v30 = vpop.f32.mrf.mxu1 }
  0xe3   : > { %779 = vpow2.f32 %v666_v22  ;;  %v669_v28 = vmul.f32 -1.442695, %v1004_v23  ;;  %v1010_v29 = vadd.f32 %v646_v10, %v315_v27  ;;  %v1013_v32 = vadd.f32 %v646_v10, %v347_v30  ;;  %v1045_v30 = vld [vmem:[%s1194_s2 + $0x1] ss:$0 sm:$0xff] }
  0xe4   : > { %781 = vpow2.f32 %v674_v25  ;;  %v677_v31 = vmul.f32 -1.442695, %v1007_v26  ;;  %v710_v33 = vpop.f32.mrf.mxu0  ;;  %v718_v36 = vpop.f32.mrf.mxu1 }
  0xe5   : > { %783 = vpow2.f32 %v669_v28  ;;  %v667_v34 = vmul.f32 -1.442695, %v1010_v29  ;;  %v1016_v35 = vadd.f32 %v710_v33, %v646_v10  ;;  %v675_v37 = vmul.f32 -1.442695, %v1013_v32 }
  0xe6   : > { %785 = vpow2.f32 %v677_v31  ;;  %v1019_v38 = vadd.f32 %v718_v36, %v646_v10  ;;  %v328_v39 = vpop.f32.mrf.mxu0  ;;  %v360_v42 = vpop.f32.mrf.mxu1  ;;  %v1050_v31 = vld [vmem:[%s1194_s2 + $0x2] ss:$0 sm:$0xff] }
  0xe7   : > { %787 = vpow2.f32 %v667_v34  ;;  %v672_v40 = vmul.f32 -1.442695, %v1016_v35  ;;  %v1022_v41 = vadd.f32 %v646_v10, %v328_v39  ;;  %v1025_v44 = vadd.f32 %v646_v10, %v360_v42 }
  0xe8   : > { %789 = vpow2.f32 %v675_v37  ;;  %v680_v43 = vmul.f32 -1.442695, %v1019_v38  ;;  %v711_v45 = vpop.f32.mrf.mxu0  ;;  %v719_v48 = vpop.f32.mrf.mxu1  ;;  %v381_v42 = vmul.f32 %v1045_v30, %v993_v12  ;;  %v379_v12 = vmul.f32 %v1045_v30, %v998_v17 }
  0xe9   : > { %791 = vpow2.f32 %v672_v40  ;;  %v670_v46 = vmul.f32 -1.442695, %v1022_v41  ;;  %v1028_v47 = vadd.f32 %v711_v45, %v646_v10  ;;  %v678_v49 = vmul.f32 -1.442695, %v1025_v44 }
  0xea   : > { %793 = vpow2.f32 %v680_v43  ;;  %v1031_v50 = vadd.f32 %v719_v48, %v646_v10  ;;  %v331_v51 = vpop.f32.mrf.mxu0  ;;  %v363_v54 = vpop.f32.mrf.mxu1  ;;  %v389_v48 = vmul.f32 %v1045_v30, %v995_v14 }
  0xeb   : > { %795 = vpow2.f32 %v670_v46  ;;  %v673_v52 = vmul.f32 -1.442695, %v1028_v47  ;;  %v1034_v53 = vadd.f32 %v646_v10, %v331_v51  ;;  %v1037_v56 = vadd.f32 %v646_v10, %v363_v54  ;;  %v1060_v46 = vld [vmem:[%s1194_s2 + $0x3] ss:$0 sm:$0xff] }
  0xec   : > { %797 = vpow2.f32 %v678_v49  ;;  %v681_v55 = vmul.f32 -1.442695, %v1031_v50 }
  0xed   : > { %799 = vpow2.f32 %v673_v52  ;;  %v671_v57 = vmul.f32 -1.442695, %v1034_v53  ;;  %v679_v59 = vmul.f32 -1.442695, %v1037_v56 }
  0xee   : > { %v776_v58 = vpop.eup %775  ;;  %801 = vpow2.f32 %v681_v55 }
  0xef   : > { %v778_v60 = vpop.eup %777  ;;  %v445_v61 = vadd.f32 1.0, %v776_v58  ;;  %803 = vpow2.f32 %v671_v57  ;;  %v387_v58 = vmul.f32 %v1045_v30, %v1001_v20 }
  0xf0   : > { %v780_v62 = vpop.eup %779  ;;  %v453_v63 = vadd.f32 1.0, %v778_v60  ;;  %805 = vpow2.f32 %v679_v59 }
  0xf1   : > { %v782_v0 = vpop.eup %781  ;;  %807 = vrcp.f32 %v445_v61  ;;  %v443_v1 = vadd.f32 1.0, %v780_v62  ;;  %v382_v62 = vmul.f32 %v1045_v30, %v1004_v23 }
  0xf2   : > { %v784_v2 = vpop.eup %783  ;;  %809 = vrcp.f32 %v453_v63  ;;  %v451_v3 = vadd.f32 1.0, %v782_v0 }
  0xf3   : > { %v786_v4 = vpop.eup %785  ;;  %811 = vrcp.f32 %v443_v1  ;;  %v446_v5 = vadd.f32 1.0, %v784_v2  ;;  %v390_v2 = vmul.f32 %v1045_v30, %v1007_v26 }
  0xf4   : > { %v788_v6 = vpop.eup %787  ;;  %813 = vrcp.f32 %v451_v3  ;;  %v454_v7 = vadd.f32 1.0, %v786_v4 }
  0xf5   : > { %v790_v8 = vpop.eup %789  ;;  %815 = vrcp.f32 %v446_v5  ;;  %v444_v9 = vadd.f32 1.0, %v788_v6  ;;  %v380_v5 = vmul.f32 %v1045_v30, %v1010_v29  ;;  %v385_v29 = vmul.f32 %v1045_v30, %v1016_v35 }
  0xf6   : > { %v792_v10 = vpop.eup %791  ;;  %817 = vrcp.f32 %v454_v7  ;;  %v452_v11 = vadd.f32 1.0, %v790_v8  ;;  %v383_v35 = vmul.f32 %v1045_v30, %v1022_v41  ;;  %v386_v41 = vmul.f32 %v1045_v30, %v1028_v47 }
  0xf7   : > { %v794_v13 = vpop.eup %793  ;;  %819 = vrcp.f32 %v444_v9  ;;  %v449_v15 = vadd.f32 1.0, %v792_v10  ;;  %v388_v9 = vmul.f32 %v1045_v30, %v1013_v32  ;;  %v393_v32 = vmul.f32 %v1045_v30, %v1019_v38 }
  0xf8   : > { %v796_v16 = vpop.eup %795  ;;  %821 = vrcp.f32 %v452_v11  ;;  %v457_v18 = vadd.f32 1.0, %v794_v13  ;;  %v391_v38 = vmul.f32 %v1045_v30, %v1025_v44 }
  0xf9   : > { %v798_v19 = vpop.eup %797  ;;  %823 = vrcp.f32 %v449_v15  ;;  %v447_v21 = vadd.f32 1.0, %v796_v16 }
  0xfa   : > { %v800_v22 = vpop.eup %799  ;;  %825 = vrcp.f32 %v457_v18  ;;  %v455_v24 = vadd.f32 1.0, %v798_v19 }
  0xfb   : > { %v802_v25 = vpop.eup %801  ;;  %827 = vrcp.f32 %v447_v21  ;;  %v450_v27 = vadd.f32 1.0, %v800_v22 }
  0xfc   : > { %v804_v28 = vpop.eup %803  ;;  %829 = vrcp.f32 %v455_v24  ;;  %v458_v33 = vadd.f32 1.0, %v802_v25 }
  0xfd   : > { %v806_v34 = vpop.eup %805  ;;  %831 = vrcp.f32 %v450_v27  ;;  %v448_v36 = vadd.f32 1.0, %v804_v28 }
  0xfe   : > { %v808_v37 = vpop.eup %807  ;;  %833 = vrcp.f32 %v458_v33  ;;  %v456_v39 = vadd.f32 1.0, %v806_v34 }
  0xff   : > { %v810_v40 = vpop.eup %809  ;;  %v497_v43 = vmul.f32 %v808_v37, %v1050_v31  ;;  %835 = vrcp.f32 %v448_v36 }
 0x100   : > { %v812_v45 = vpop.eup %811  ;;  %v505_v49 = vmul.f32 %v810_v40, %v1050_v31  ;;  %837 = vrcp.f32 %v456_v39 }
 0x101   : > { %v814_v51 = vpop.eup %813  ;;  %v513_v52 = vadd.f32 %v497_v43, %v381_v42  ;;  %v495_v54 = vmul.f32 %v812_v45, %v1050_v31 }
 0x102   : > { %v816_v55 = vpop.eup %815  ;;  %v521_v57 = vadd.f32 %v505_v49, %v389_v48  ;;  %v503_v59 = vmul.f32 %v814_v51, %v1050_v31  ;;  %v394_v49 = vmul.f32 %v1045_v30, %v1031_v50  ;;  %v392_v50 = vmul.f32 %v1045_v30, %v1037_v56 }
 0x103   : > { %v818_v60 = vpop.eup %817  ;;  %v533_v14 = vadd.f32 %v1060_v46, %v513_v52  ;;  %v511_v61 = vadd.f32 %v495_v54, %v379_v12  ;;  %v498_v63 = vmul.f32 %v816_v55, %v1050_v31  ;;  %v384_v54 = vmul.f32 %v1045_v30, %v1034_v53 }
 0x104   : > { %v820_v0 = vpop.eup %819  ;;  %v541_v17 = vadd.f32 %v1060_v46, %v521_v57  ;;  %v519_v1 = vadd.f32 %v503_v59, %v387_v58  ;;  %v506_v20 = vmul.f32 %v818_v60, %v1050_v31 }
 0x105   : > { %v822_v3 = vpop.eup %821  ;;  %549 = vst [vmem:[%s1079_s25 + $0x10] sm:$0xff] %v533_v14  ;;  %v531_v23 = vadd.f32 %v1060_v46, %v511_v61  ;;  %v514_v4 = vadd.f32 %v498_v63, %v382_v62  ;;  %v496_v6 = vmul.f32 %v820_v0, %v1050_v31 }
 0x106   : > { %v824_v7 = vpop.eup %823  ;;  %557 = vst [vmem:[%s1079_s25 + $0x50] sm:$0xff] %v541_v17  ;;  %v539_v26 = vadd.f32 %v1060_v46, %v519_v1  ;;  %v522_v8 = vadd.f32 %v506_v20, %v390_v2  ;;  %v504_v10 = vmul.f32 %v822_v3, %v1050_v31 }
 0x107   : > { %v826_v11 = vpop.eup %825  ;;  %547 = vst [vmem:[%s1079_s25] sm:$0xff] %v531_v23  ;;  %v534_v13 = vadd.f32 %v1060_v46, %v514_v4  ;;  %v512_v15 = vadd.f32 %v496_v6, %v380_v5  ;;  %v501_v16 = vmul.f32 %v824_v7, %v1050_v31 }
 0x108   : > { %v828_v18 = vpop.eup %827  ;;  %555 = vst [vmem:[%s1079_s25 + $0x40] sm:$0xff] %v539_v26  ;;  %v542_v19 = vadd.f32 %v1060_v46, %v522_v8  ;;  %v520_v21 = vadd.f32 %v504_v10, %v388_v9  ;;  %v509_v22 = vmul.f32 %v826_v11, %v1050_v31 }
 0x109   : > { %v830_v24 = vpop.eup %829  ;;  %550 = vst [vmem:[%s1079_s25 + $0x18] sm:$0xff] %v534_v13  ;;  %v532_v25 = vadd.f32 %v1060_v46, %v512_v15  ;;  %v517_v27 = vadd.f32 %v501_v16, %v385_v29  ;;  %v499_v28 = vmul.f32 %v828_v18, %v1050_v31 }
 0x10a   : > { %v832_v33 = vpop.eup %831  ;;  %558 = vst [vmem:[%s1079_s25 + $0x58] sm:$0xff] %v542_v19  ;;  %v540_v34 = vadd.f32 %v1060_v46, %v520_v21  ;;  %v525_v36 = vadd.f32 %v509_v22, %v393_v32  ;;  %v507_v37 = vmul.f32 %v830_v24, %v1050_v31 }
 0x10b   : > { %v834_v39 = vpop.eup %833  ;;  %548 = vst [vmem:[%s1079_s25 + $0x8] sm:$0xff] %v532_v25  ;;  %v537_v40 = vadd.f32 %v1060_v46, %v517_v27  ;;  %v515_v42 = vadd.f32 %v499_v28, %v383_v35  ;;  %v502_v43 = vmul.f32 %v832_v33, %v1050_v31 }
 0x10c   : > { %v836_v45 = vpop.eup %835  ;;  %556 = vst [vmem:[%s1079_s25 + $0x48] sm:$0xff] %v540_v34  ;;  %v545_v48 = vadd.f32 %v1060_v46, %v525_v36  ;;  %v523_v44 = vadd.f32 %v507_v37, %v391_v38  ;;  %v510_v51 = vmul.f32 %v834_v39, %v1050_v31 }
 0x10d   : > { %v838_v52 = vpop.eup %837  ;;  %553 = vst [vmem:[%s1079_s25 + $0x30] sm:$0xff] %v537_v40  ;;  %v535_v47 = vadd.f32 %v1060_v46, %v515_v42  ;;  %v518_v12 = vadd.f32 %v502_v43, %v386_v41  ;;  %v500_v55 = vmul.f32 %v836_v45, %v1050_v31 }
 0x10e   : > { %561 = vst [vmem:[%s1079_s25 + $0x70] sm:$0xff] %v545_v48  ;;  %v543_v57 = vadd.f32 %v1060_v46, %v523_v44  ;;  %v526_v58 = vadd.f32 %v510_v51, %v394_v49  ;;  %v508_v59 = vmul.f32 %v838_v52, %v1050_v31 }
 0x10f   : > { %551 = vst [vmem:[%s1079_s25 + $0x20] sm:$0xff] %v535_v47  ;;  %v538_v53 = vadd.f32 %v1060_v46, %v518_v12  ;;  %v516_v60 = vadd.f32 %v500_v55, %v384_v54 }
 0x110   : > { %559 = vst [vmem:[%s1079_s25 + $0x60] sm:$0xff] %v543_v57  ;;  %v546_v14 = vadd.f32 %v1060_v46, %v526_v58  ;;  %v524_v61 = vadd.f32 %v508_v59, %v392_v50 }
 0x111   : > { %554 = vst [vmem:[%s1079_s25 + $0x38] sm:$0xff] %v538_v53  ;;  %v536_v62 = vadd.f32 %v1060_v46, %v516_v60 }
 0x112   : > { %562 = vst [vmem:[%s1079_s25 + $0x78] sm:$0xff] %v546_v14  ;;  %v544_v56 = vadd.f32 %v1060_v46, %v524_v61 }
 0x113   : > { %552 = vst [vmem:[%s1079_s25 + $0x28] sm:$0xff] %v536_v62 }
 0x114   : > { %560 = vst [vmem:[%s1079_s25 + $0x68] sm:$0xff] %v544_v56 }
 0x115   : > { %852 = shalt.err (!%p849_p3)
}
 0x116   : > { %s853_s8 = scalar_lea.hbm %s1142_s30, 2048  ;;  %s857_s11 = scalar_lea.hbm %s1195_s3, 8192 }
 0x117   : > { %p854_p4 = scmp.ne.s32.totalorder %s1142_s30, %s853_s8  ;;  %p858_p9 = scmp.lt.s32.totalorder %s1142_s30, %s1195_s3 }
 0x118   : > { %p859_p10 = scmp.lt.s32.totalorder %s857_s11, %s853_s8 }
 0x119   : > { %p855_p7 = pnand %p854_p4, %p962_p5 }
 0x11a   : > { %p860_p11 = por %p859_p10, %p858_p9 }
 0x11b   : > { %p856_p8 = pneg %p855_p7 }
 0x11d   : > { %p861_p12 = pnand %p860_p11, %p856_p8 }
 0x11f   : > { %864 = shalt.err (!%p861_p12)
}
 0x120   : > { %s902_s20 = smov 128   ;;  %s903_s24 = smov 8  }
 0x121   : > { %724 = dma.vmem_to_hbm [thread:$0]  (%p962_p5), %s1144_s27, 2048, %s1142_s30, %s1152_s16, %s902_s20, %s902_s20, %s903_s24  }
 0x122 PF: > { %p730_p13 = scmp.ge.s32.totalorder %s899_s15, 2  ;;  %s592_s25 = sand.u32 1, %s887_s12  }
 0x123   : > { %s593_s26 = scalar_lea.sflag [#allocation3], %s592_s25 }
 0x124   : > { %p727_p0 = pnand %p730_p13, %p966_p6 }
 0x126   : > { %p728_p1 = pneg %p727_p0 }
 0x128   : > { %882 = dma.done.wait (%p728_p1), %s593_s26, 2048  }
 0x129   : > { %884 = vsyncadd (%p728_p1), %s593_s26, 4294965248  ;;  %p13_p2 = scmp.ge.s32.totalorder %s949_s18, 6   ;;  %s1198_s12 = smov %s891_s13 }
 0x12a   : > { %s1199_s13 = smov %s895_s14  ;;  %s1200_s14 = smov %s960_s21 }
 0x12b   : > { %s1201_s15 = smov %s949_s18  ;;  %15 = sbr.rel (!%p13_p2) target bundleno = 3 (0x3), region = 67 }
 0x130   :  { %598 = vsyncpa [#allocation3], 1 }
 0x131   :  { %600 = vsyncpa [#allocation3 + $0x1], 1 }

</bundles_post_ra>
